<compile_context>
chip_gen: v7x
topology: tpu7x:2x2x1
jax: 0.10.0
libtpu: 0.0.40
codegen_flags: <defaults>
</compile_context>

<pallas_src>
import jax
import jax.numpy as jnp
from jax.experimental import pallas as pl
from jax.experimental.pallas import tpu as pltpu

HEAD_PAD = 128  # lane-dense width for the fused (sigmoid | tanh*3) head


def actor_kernel(x_ref, w1_ref, b1_ref, w2_ref, b2_ref, w34_ref, b34_ref, o_ref):
    # fc1 + relu
    h1 = jnp.dot(x_ref[...], w1_ref[...], preferred_element_type=jnp.float32)
    h1 = jnp.maximum(h1 + b1_ref[...], 0.0)
    # fc2 + relu
    h2 = jnp.dot(h1, w2_ref[...], preferred_element_type=jnp.float32)
    h2 = jnp.maximum(h2 + b2_ref[...], 0.0)
    # fused fc3 | fc4 head, lane-padded to 128 columns
    z = jnp.dot(h2, w34_ref[...], preferred_element_type=jnp.float32) + b34_ref[...]
    col = jax.lax.broadcasted_iota(jnp.int32, z.shape, dimension=1)
    is_c = col == 0
    # single tanh on the whole tile: sigmoid(z) = 0.5 * (1 + tanh(z / 2))
    t = jnp.tanh(jnp.where(is_c, 0.5 * z, z))
    o_ref[...] = jnp.where(is_c, 0.5 + 0.5 * t, 3.0 * t).astype(o_ref.dtype)


def actor_forward(x, params, *, block_b=256):
    """x: (B, obs_dim) float32. Returns (B, 4) = concat([sigmoid, tanh*3])."""
    w1, b1, w2, b2, w34, b34 = params
    B, obs_dim = x.shape

    # Batch tile: multiple of 8 sublanes, no bigger than needed; fills the
    # MXU M dimension (128/256) once the batch is large enough.
    tb = min(block_b, max(8, ((B + 7) // 8) * 8))
    B_pad = ((B + tb - 1) // tb) * tb
    if B_pad != B:
        x = jnp.pad(x, ((0, B_pad - B), (0, 0)))

    # Lane-pad the fused head so the output store is unmasked (lane-dense).
    w34p = jnp.pad(w34, ((0, 0), (0, HEAD_PAD - w34.shape[1])))
    b34p = jnp.pad(b34, ((0, 0), (0, HEAD_PAD - b34.shape[1])))

    const = lambda i: (0, 0)  # weights/biases stay VMEM-resident across steps

    out = pl.pallas_call(
        actor_kernel,
        out_shape=jax.ShapeDtypeStruct((B_pad, HEAD_PAD), jnp.float32),
        grid=(B_pad // tb,),
        in_specs=[
            pl.BlockSpec((tb, obs_dim), lambda i: (i, 0)),  # streamed x tiles
            pl.BlockSpec(w1.shape, const),
            pl.BlockSpec(b1.shape, const),
            pl.BlockSpec(w2.shape, const),
            pl.BlockSpec(b2.shape, const),
            pl.BlockSpec(w34p.shape, const),
            pl.BlockSpec(b34p.shape, const),
        ],
        out_specs=pl.BlockSpec((tb, HEAD_PAD), lambda i: (i, 0)),
        compiler_params=pltpu.CompilerParams(
            dimension_semantics=("parallel",),  # shard batch tiles across TCs (v7x)
        ),
    )(x, w1, b1, w2, b2, w34p, b34p)
    return out[:B, :4]


def make_params(key, obs_dim, hidden_dim):
    """Deterministic orthogonal weights (gain=1.0), zero biases — mirrors
    orthogonal_init() in the PyTorch module.  Weights stored as (in, out)."""
    k1, k2, k3, k4 = jax.random.split(key, 4)
    ortho = jax.nn.initializers.orthogonal(scale=1.0)
    # PyTorch Linear weight is (out, in); orthogonal_ is applied to that shape,
    # then we transpose to (in, out) for the kernel's x @ W convention.
    w1 = ortho(k1, (hidden_dim, obs_dim), jnp.float32).T
    w2 = ortho(k2, (hidden_dim, hidden_dim), jnp.float32).T
    w3 = ortho(k3, (1, hidden_dim), jnp.float32).T         # (hidden, 1)
    w4 = ortho(k4, (3, hidden_dim), jnp.float32).T         # (hidden, 3)
    w34 = jnp.concatenate([w3, w4], axis=1)                # (hidden, 4) fused head
    b1 = jnp.zeros((1, hidden_dim), jnp.float32)
    b2 = jnp.zeros((1, hidden_dim), jnp.float32)
    b34 = jnp.zeros((1, 4), jnp.float32)
    return w1, b1, w2, b2, w34, b34


def actor_reference(x, params):
    """Pure-JAX reference matching the PyTorch forward."""
    w1, b1, w2, b2, w34, b34 = params
    h1 = jax.nn.relu(x @ w1 + b1)
    h2 = jax.nn.relu(h1 @ w2 + b2)
    z = h2 @ w34 + b34
    c = jax.nn.sigmoid(z[:, :1])
    w = jnp.tanh(z[:, 1:]) * 3.0
    return jnp.concatenate([c, w], axis=-1)


if __name__ == "__main__":
    # Small shapes consistent with the module; batch chosen non-divisible by
    # the tile to exercise the padding path and give a 2-step grid.
    batch, obs_dim, hidden_dim = 300, 32, 32

    key = jax.random.PRNGKey(0)
    kx, kp = jax.random.split(key)
    x = jax.random.normal(kx, (batch, obs_dim), dtype=jnp.float32)
    params = make_params(kp, obs_dim, hidden_dim)

    out = actor_forward(x, params, block_b=256)
    out = jax.block_until_ready(out)

    ref = actor_reference(x, params)
    assert out.shape == (batch, 4), out.shape
    assert jnp.allclose(out, ref, atol=1e-5, rtol=1e-5), (
        float(jnp.max(jnp.abs(out - ref))))

    print("KERNEL_OK")
</pallas_src>

<mosaic_0001>
module attributes {stable_mosaic.version = 11 : i64} {
  func.func @actor_kernel(%arg0: i32, %arg1: memref<256x32xf32, #tpu.memory_space<vmem>>, %arg2: memref<32x32xf32, #tpu.memory_space<vmem>>, %arg3: memref<1x32xf32, #tpu.memory_space<vmem>>, %arg4: memref<32x32xf32, #tpu.memory_space<vmem>>, %arg5: memref<1x32xf32, #tpu.memory_space<vmem>>, %arg6: memref<32x128xf32, #tpu.memory_space<vmem>>, %arg7: memref<1x128xf32, #tpu.memory_space<vmem>>, %arg8: memref<256x128xf32, #tpu.memory_space<vmem>>) attributes {dimension_semantics = [#tpu.dimension_semantics<parallel>], iteration_bounds = array<i64: 2>, scalar_prefetch = 0 : i64, scratch_operands = 0 : i64, tpu.core_type = #tpu.core_type<tc>, window_params = [{transform_indices = @transform_0, window_bounds = array<i64: 256, 32>}, {pipeline_mode = #tpu.pipeline_mode<synchronous>, transform_indices = @transform_1, window_bounds = array<i64: 32, 32>}, {pipeline_mode = #tpu.pipeline_mode<synchronous>, transform_indices = @transform_2, window_bounds = array<i64: 1, 32>}, {pipeline_mode = #tpu.pipeline_mode<synchronous>, transform_indices = @transform_3, window_bounds = array<i64: 32, 32>}, {pipeline_mode = #tpu.pipeline_mode<synchronous>, transform_indices = @transform_4, window_bounds = array<i64: 1, 32>}, {pipeline_mode = #tpu.pipeline_mode<synchronous>, transform_indices = @transform_5, window_bounds = array<i64: 32, 128>}, {pipeline_mode = #tpu.pipeline_mode<synchronous>, transform_indices = @transform_6, window_bounds = array<i64: 1, 128>}, {transform_indices = @transform_7, window_bounds = array<i64: 256, 128>}]} {
    %c0 = arith.constant 0 : index
    %c0_0 = arith.constant 0 : index
    %0 = vector.load %arg1[%c0, %c0_0] : memref<256x32xf32, #tpu.memory_space<vmem>>, vector<256x32xf32>
    %c0_1 = arith.constant 0 : index
    %c0_2 = arith.constant 0 : index
    %1 = vector.load %arg2[%c0_1, %c0_2] : memref<32x32xf32, #tpu.memory_space<vmem>>, vector<32x32xf32>
    %cst = arith.constant dense<0.000000e+00> : vector<256x32xf32>
    %2 = tpu.matmul %0, %1, %cst {dimension_numbers = #tpu.dot_dimension_numbers<[1], [0], [0], [1], [0, 0, 1, 1], [], []>} : vector<256x32xf32>, vector<32x32xf32>, vector<256x32xf32> -> vector<256x32xf32>
    %c0_3 = arith.constant 0 : index
    %c0_4 = arith.constant 0 : index
    %3 = vector.load %arg3[%c0_3, %c0_4] : memref<1x32xf32, #tpu.memory_space<vmem>>, vector<1x32xf32>
    %4 = vector.broadcast %3 : vector<1x32xf32> to vector<256x32xf32>
    %5 = arith.addf %2, %4 : vector<256x32xf32>
    %cst_5 = arith.constant 0.000000e+00 : f32
    %6 = vector.broadcast %cst_5 : f32 to vector<256x32xf32>
    %7 = arith.maximumf %5, %6 : vector<256x32xf32>
    %c0_6 = arith.constant 0 : index
    %c0_7 = arith.constant 0 : index
    %8 = vector.load %arg4[%c0_6, %c0_7] : memref<32x32xf32, #tpu.memory_space<vmem>>, vector<32x32xf32>
    %cst_8 = arith.constant dense<0.000000e+00> : vector<256x32xf32>
    %9 = tpu.matmul %7, %8, %cst_8 {dimension_numbers = #tpu.dot_dimension_numbers<[1], [0], [0], [1], [0, 0, 1, 1], [], []>} : vector<256x32xf32>, vector<32x32xf32>, vector<256x32xf32> -> vector<256x32xf32>
    %c0_9 = arith.constant 0 : index
    %c0_10 = arith.constant 0 : index
    %10 = vector.load %arg5[%c0_9, %c0_10] : memref<1x32xf32, #tpu.memory_space<vmem>>, vector<1x32xf32>
    %11 = vector.broadcast %10 : vector<1x32xf32> to vector<256x32xf32>
    %12 = arith.addf %9, %11 : vector<256x32xf32>
    %cst_11 = arith.constant 0.000000e+00 : f32
    %13 = vector.broadcast %cst_11 : f32 to vector<256x32xf32>
    %14 = arith.maximumf %12, %13 : vector<256x32xf32>
    %c0_12 = arith.constant 0 : index
    %c0_13 = arith.constant 0 : index
    %15 = vector.load %arg6[%c0_12, %c0_13] : memref<32x128xf32, #tpu.memory_space<vmem>>, vector<32x128xf32>
    %cst_14 = arith.constant dense<0.000000e+00> : vector<256x128xf32>
    %16 = tpu.matmul %14, %15, %cst_14 {dimension_numbers = #tpu.dot_dimension_numbers<[1], [0], [0], [1], [0, 0, 1, 1], [], []>} : vector<256x32xf32>, vector<32x128xf32>, vector<256x128xf32> -> vector<256x128xf32>
    %c0_15 = arith.constant 0 : index
    %c0_16 = arith.constant 0 : index
    %17 = vector.load %arg7[%c0_15, %c0_16] : memref<1x128xf32, #tpu.memory_space<vmem>>, vector<1x128xf32>
    %18 = vector.broadcast %17 : vector<1x128xf32> to vector<256x128xf32>
    %19 = arith.addf %16, %18 : vector<256x128xf32>
    %20 = tpu.iota {dimensions = array<i32: 1>} : vector<256x128xi32>
    %c0_i32 = arith.constant 0 : i32
    %21 = vector.broadcast %c0_i32 : i32 to vector<256x128xi32>
    %22 = arith.cmpi eq, %20, %21 : vector<256x128xi32>
    %cst_17 = arith.constant 5.000000e-01 : f32
    %23 = vector.broadcast %cst_17 : f32 to vector<256x128xf32>
    %24 = arith.mulf %23, %19 : vector<256x128xf32>
    %25 = arith.select %22, %24, %19 : vector<256x128xi1>, vector<256x128xf32>
    %26 = math.tanh %25 : vector<256x128xf32>
    %cst_18 = arith.constant 5.000000e-01 : f32
    %27 = vector.broadcast %cst_18 : f32 to vector<256x128xf32>
    %28 = arith.mulf %27, %26 : vector<256x128xf32>
    %cst_19 = arith.constant 5.000000e-01 : f32
    %29 = vector.broadcast %cst_19 : f32 to vector<256x128xf32>
    %30 = arith.addf %29, %28 : vector<256x128xf32>
    %cst_20 = arith.constant 3.000000e+00 : f32
    %31 = vector.broadcast %cst_20 : f32 to vector<256x128xf32>
    %32 = arith.mulf %31, %26 : vector<256x128xf32>
    %33 = arith.select %22, %30, %32 : vector<256x128xi1>, vector<256x128xf32>
    %c0_21 = arith.constant 0 : index
    %c0_22 = arith.constant 0 : index
    %34 = vector.load %arg8[%c0_21, %c0_22] : memref<256x128xf32, #tpu.memory_space<vmem>>, vector<256x128xf32>
    tpu.vector_store %arg8[%c0_21, %c0_22], %33 {strides = array<i32>} : memref<256x128xf32, #tpu.memory_space<vmem>>, vector<256x128xf32>,
    return
  }
  func.func @transform_0(%arg0: i32) -> (i32, i32) {
    %c0_i32 = arith.constant 0 : i32
    %c0_i32_0 = arith.constant 0 : i32
    return %arg0, %c0_i32 : i32, i32
  }
  func.func @transform_1(%arg0: i32) -> (i32, i32) {
    %c0_i32 = arith.constant 0 : i32
    %c0_i32_0 = arith.constant 0 : i32
    %c0_i32_1 = arith.constant 0 : i32
    return %c0_i32, %c0_i32_0 : i32, i32
  }
  func.func @transform_2(%arg0: i32) -> (i32, i32) {
    %c0_i32 = arith.constant 0 : i32
    %c0_i32_0 = arith.constant 0 : i32
    %c0_i32_1 = arith.constant 0 : i32
    return %c0_i32, %c0_i32_0 : i32, i32
  }
  func.func @transform_3(%arg0: i32) -> (i32, i32) {
    %c0_i32 = arith.constant 0 : i32
    %c0_i32_0 = arith.constant 0 : i32
    %c0_i32_1 = arith.constant 0 : i32
    return %c0_i32, %c0_i32_0 : i32, i32
  }
  func.func @transform_4(%arg0: i32) -> (i32, i32) {
    %c0_i32 = arith.constant 0 : i32
    %c0_i32_0 = arith.constant 0 : i32
    %c0_i32_1 = arith.constant 0 : i32
    return %c0_i32, %c0_i32_0 : i32, i32
  }
  func.func @transform_5(%arg0: i32) -> (i32, i32) {
    %c0_i32 = arith.constant 0 : i32
    %c0_i32_0 = arith.constant 0 : i32
    %c0_i32_1 = arith.constant 0 : i32
    return %c0_i32, %c0_i32_0 : i32, i32
  }
  func.func @transform_6(%arg0: i32) -> (i32, i32) {
    %c0_i32 = arith.constant 0 : i32
    %c0_i32_0 = arith.constant 0 : i32
    %c0_i32_1 = arith.constant 0 : i32
    return %c0_i32, %c0_i32_0 : i32, i32
  }
  func.func @transform_7(%arg0: i32) -> (i32, i32) {
    %c0_i32 = arith.constant 0 : i32
    %c0_i32_0 = arith.constant 0 : i32
    return %arg0, %c0_i32 : i32, i32
  }
}

</mosaic_0001>

<bundles_post_ra>
// kernel: tpu_custom_call.1
= control target key start
LH: loop header
LB: loop body
LE: loop exit
PB: predicated region body
PF: predicated region fallthrough
CT: control target
= control target key end

     0   :  { %12 = vsyncpa [#allocation3], 0  ;;  %s2897_s0 = inlined_call_operand.vmem [shape: f32[512,32], index: 0, kind: input, shape index: {}]   ;;  %s2898_s1 = inlined_call_operand.vmem [shape: f32[32,32], index: 1, kind: input, shape index: {}]   ;;  %s2899_s2 = inlined_call_operand.vmem [shape: f32[1,32], index: 2, kind: input, shape index: {}]   ;;  %s2900_s3 = inlined_call_operand.vmem [shape: f32[32,32], index: 3, kind: input, shape index: {}]   ;;  %s2901_s4 = inlined_call_operand.vmem [shape: f32[1,32], index: 4, kind: input, shape index: {}]   ;;  %s2902_s5 = inlined_call_operand.vmem [shape: f32[32,128], index: 5, kind: input, shape index: {}]   ;;  %s2903_s6 = inlined_call_operand.vmem [shape: f32[1,128], index: 6, kind: input, shape index: {}]   ;;  %s2904_s7 = inlined_call_operand.hbm [shape: f32[512,128], index: 7, kind: output, shape index: {}]  }
   0x1   :  { %14 = vsyncpa [#allocation3 + $0x1], 0  ;;  %s2336_s24 = smov 0   ;;  %s2338_s25 = smov 0  }
   0x2   :  { %s2340_s26 = smov 0   ;;  %s2342_s27 = smov 0  }
   0x3 LB: > { %s2357_s28 = sadd.s32 4294967295, %s2291_s27   ;;  %s1708_s29 = sadd.s32 4294967294, %s2291_s27   ;;  %s2291_s27 = sphi %s2342_s27, %s2910_s27   ;;  %s2287_s26 = sphi %s2340_s26, %s2909_s26   ;;  %s2283_s25 = sphi %s2338_s25, %s2908_s25   ;;  %s2279_s24 = sphi %s2336_s24, %s2907_s24  }
   0x4   : > { %s2361_s30 = sadd.s32 1, %s2291_s27   ;;  %s179_s8 = sadd.s32 1, %s2287_s26 }
   0x5   : > { %s176_s9 = ssub.s32 %s2291_s27, %s2361_s30  ;;  %p189_p0 = scmp.ne.s32.totalorder %s2287_s26, %s2283_s25 }
   0x6   : > { %p177_p1 = scmp.eq.s32.totalorder %s176_s9, 0  ;;  %p190_p2 = scmp.eq.s32.totalorder %s2357_s28, 1 }
   0x7   : > { %p195_p3 = scmp.ne.s32.totalorder %s2283_s25, %s2279_s24  ;;  %p196_p4 = scmp.eq.s32.totalorder %s1708_s29, 1 }
   0x8   : > { %s2372_s10 = scalar_select %p177_p1, %s2287_s26, %s179_s8  }
   0x9   : > { %p2374_p5 = por %p190_p2, %p189_p0  ;;  %p2378_p6 = por %p196_p4, %p195_p3 }
   0xa   : > { %p1711_p7 = scmp.ge.s32.totalorder %s2291_s27, 1  ;;  %p241_p8 = scmp.lt.s32.totalorder %s2291_s27, 3 }
   0xc   : > { %p242_p9 = pnand %p1711_p7, %p241_p8 }
   0xd   : > { %v312_v0 = vld [vmem:[%s2898_s1] sm:$0xff] (!%p242_p9)  ;;  %v313_v1 = vld [vmem:[%s2898_s1 + $0x8] sm:$0xff] (!%p242_p9)  ;;  %v314_v2 = vld [vmem:[%s2898_s1 + $0x10] sm:$0xff] (!%p242_p9)  ;;  %s1713_s19 = sshll.u32 (!%p242_p9), %s2357_s28, 5  ;;  %vm323_vm0 = vcmask (!%p242_p9), 261120   ;;  %s270_s20 = sand.u32 (!%p242_p9), 1, %s2283_s25  }
   0xe   : > { %245 = sbr.rel (%p242_p9) target bundleno = 772 (0x304), region = 48  ;;  %v2096_v3 = vpack.c.bf16 (!%p242_p9), %v313_v1, %v312_v0  ;;  %v315_v4 = vld [vmem:[%s2898_s1 + $0x18] sm:$0xff] (!%p242_p9)  ;;  %p274_p10 = scmp.lt.s32.totalorder (!%p242_p9), %s1713_s19, 63  ;;  %v677_v6 = vld [vmem:[%s2900_s3] sm:$0xff] (!%p242_p9)  ;;  %v678_v7 = vld [vmem:[%s2900_s3 + $0x8] sm:$0xff] (!%p242_p9) }
   0xf   : > { %v2100_v5 = vpack.c.bf16 (!%p242_p9), %v315_v4, %v314_v2  ;;  %v2104_v8 = vpack.c.bf16 (!%p242_p9), %v678_v7, %v677_v6  ;;  %v679_v12 = vld [vmem:[%s2900_s3 + $0x10] sm:$0xff] (!%p242_p9)  ;;  %v680_v13 = vld [vmem:[%s2900_s3 + $0x18] sm:$0xff] (!%p242_p9)  ;;  %v1041_v44 = vld [vmem:[%s2902_s5] sm:$0xff] (!%p242_p9)  ;;  %s1712_s21 = sshll.u32 (!%p242_p9), %s270_s20, 8  ;;  %s1819_s23 = sshll.u32 (!%p242_p9), %s2357_s28, 12 }
  0x10   : > { %2097 = vmatprep.subr.bf16.mxu0 (!%p242_p9), %v2096_v3  ;;  %2120 = vmatprep.subr.bf16.mxu1 (!%p242_p9), %v2096_v3  ;;  %v2108_v19 = vpack.c.bf16 (!%p242_p9), %v680_v13, %v679_v12  ;;  %v1042_v45 = vld [vmem:[%s2902_s5 + $0x8] sm:$0xff] (!%p242_p9)  ;;  %v1043_v46 = vld [vmem:[%s2902_s5 + $0x10] sm:$0xff] (!%p242_p9)  ;;  %v1044_v48 = vld [vmem:[%s2902_s5 + $0x18] sm:$0xff] (!%p242_p9)  ;;  %s2681_s22 = scalar_lea.vmem (!%p242_p9), [#allocation2], %s1712_s21  ;;  %s2847_s13 = scalar_lea.hbm (!%p242_p9), %s2904_s7, %s1819_s23 }
  0x11   : > { %2099 = vmatpush3.bf16.msra.mxu0 (!%p242_p9), %v2096_v3  ;;  %2122 = vmatpush3.bf16.msra.mxu1 (!%p242_p9), %v2096_v3  ;;  %v2112_v47 = vpack.c.bf16 (!%p242_p9), %v1042_v45, %v1041_v44  ;;  %v2116_v49 = vpack.c.bf16 (!%p242_p9), %v1044_v48, %v1043_v46  ;;  %v2493_v50 = vld [vmem:[%s2899_s2] ss:$0 sm:$0xff] (!%p242_p9)  ;;  %s1646_s29 = sshll.u32 (!%p242_p9), %s2681_s22, 4  ;;  %s2856_s28 = scalar_lea.sflag (!%p242_p9), [#allocation3], %s270_s20  ;;  %s2849_s29 = int_to_ptr.vmem [resolvable:$true] %s1646_s29 }
  0x12   : > { %2101 = vmatprep.subr.bf16.mxu0 (!%p242_p9), %v2100_v5  ;;  %2121 = vmatprep.subr.bf16.mxu1 (!%p242_p9), %v2100_v5  ;;  %s2229_s14 = scalar_lea.vmem (!%p242_p9), %s2849_s29, 4096 }
  0x13   : > { %p2230_p11 = scmp.ne.s32.totalorder (!%p242_p9), %s2849_s29, %s2229_s14 }
  0x15   : > { %s2912_s19 = smov (!%p274_p10, %s1713_s19), 63  ;;  %2103 = vmatpush3.bf16.msra.mxu0 %v2100_v5  ;;  %2123 = vmatpush3.bf16.msra.mxu1 %v2100_v5  ;;  %p2231_p12 = pnand %p2230_p11, %p2374_p5 }
  0x16   : > { %s1714_s9 = sshll.u32 %s2912_s19, 3  ;;  %2105 = vmatprep.subr.bf16.mxu1 %v2104_v8  ;;  %2113 = vmatprep.subr.bf16.mxu0 %v2112_v47 }
  0x17   : > { %s2406_s15 = scalar_lea.vmem %s2897_s0, %s1714_s9  ;;  %p2232_p13 = pneg %p2231_p12 }
  0x18   : > { %v280_v9 = vld [vmem:[%s2406_s15] sm:$0xff]  ;;  %v281_v10 = vld [vmem:[%s2406_s15 + $0x8] sm:$0xff]  ;;  %v282_v11 = vld [vmem:[%s2406_s15 + $0x10] sm:$0xff] }
  0x19   : > { %1936 = vmatprep.mubr.msk.f32.mxu0 %vm323_vm0, %v280_v9  ;;  %v283_v14 = vld [vmem:[%s2406_s15 + $0x18] sm:$0xff]  ;;  %v296_v15 = vld [vmem:[%s2406_s15 + $0x80] sm:$0xff]  ;;  %v297_v16 = vld [vmem:[%s2406_s15 + $0x88] sm:$0xff] }
  0x1a   : > { %1937 = vmatmul.mubr.msk.f32.vlgmr.msra.gmra.mrb[0].mxu0 %vm323_vm0, %v281_v10  ;;  %v284_v17 = vld [vmem:[%s2406_s15 + $0x20] sm:$0xff]  ;;  %1960 = vmatprep.mubr.msk.f32.mxu1 %vm323_vm0, %v296_v15  ;;  %v298_v18 = vld [vmem:[%s2406_s15 + $0x90] sm:$0xff]  ;;  %v299_v20 = vld [vmem:[%s2406_s15 + $0x98] sm:$0xff] }
  0x1b   : > { %1939 = vmatprep.mubr.msk.f32.mxu0 %vm323_vm0, %v282_v11  ;;  %1961 = vmatmul.mubr.msk.f32.vlgmr.msra.gmra.mrb[0].mxu1 %vm323_vm0, %v297_v16  ;;  %v285_v21 = vld [vmem:[%s2406_s15 + $0x28] sm:$0xff]  ;;  %v300_v22 = vld [vmem:[%s2406_s15 + $0xa0] sm:$0xff]  ;;  %v286_v23 = vld [vmem:[%s2406_s15 + $0x30] sm:$0xff] }
  0x1c   : > { %1963 = vmatprep.mubr.msk.f32.mxu1 %vm323_vm0, %v298_v18  ;;  %2107 = vmatpush3.bf16.msra.mxu1 %v2104_v8  ;;  %v301_v24 = vld [vmem:[%s2406_s15 + $0xa8] sm:$0xff]  ;;  %v287_v25 = vld [vmem:[%s2406_s15 + $0x38] sm:$0xff]  ;;  %v302_v26 = vld [vmem:[%s2406_s15 + $0xb0] sm:$0xff] }
  0x1d   : > { %2109 = vmatprep.subr.bf16.mxu1 %v2108_v19  ;;  %v288_v27 = vld [vmem:[%s2406_s15 + $0x40] sm:$0xff]  ;;  %v303_v28 = vld [vmem:[%s2406_s15 + $0xb8] sm:$0xff]  ;;  %v289_v29 = vld [vmem:[%s2406_s15 + $0x48] sm:$0xff]  ;;  %2115 = vmatpush3.bf16.msra.mxu0 %v2112_v47 }
  0x1e   : > { %1940 = vmatmul.mubr.msk.f32.gmra.mrb[2].mxu0 %vm323_vm0, %v283_v14  ;;  %v304_v30 = vld [vmem:[%s2406_s15 + $0xc0] sm:$0xff]  ;;  %v290_v31 = vld [vmem:[%s2406_s15 + $0x50] sm:$0xff]  ;;  %v305_v32 = vld [vmem:[%s2406_s15 + $0xc8] sm:$0xff]  ;;  %2117 = vmatprep.subr.bf16.mxu0 %v2116_v49 }
  0x1f   : > { %1942 = vmatprep.mubr.msk.f32.mxu0 %vm323_vm0, %v284_v17  ;;  %1964 = vmatmul.mubr.msk.f32.gmra.mrb[2].mxu1 %vm323_vm0, %v299_v20  ;;  %v291_v33 = vld [vmem:[%s2406_s15 + $0x58] sm:$0xff]  ;;  %v306_v34 = vld [vmem:[%s2406_s15 + $0xd0] sm:$0xff]  ;;  %v292_v35 = vld [vmem:[%s2406_s15 + $0x60] sm:$0xff] }
  0x20   : > { %1966 = vmatprep.mubr.msk.f32.mxu1 %vm323_vm0, %v300_v22  ;;  %2111 = vmatpush3.bf16.msra.mxu1 %v2108_v19  ;;  %v307_v36 = vld [vmem:[%s2406_s15 + $0xd8] sm:$0xff]  ;;  %v293_v37 = vld [vmem:[%s2406_s15 + $0x68] sm:$0xff]  ;;  %v308_v38 = vld [vmem:[%s2406_s15 + $0xe0] sm:$0xff] }
  0x21   : > { %v294_v39 = vld [vmem:[%s2406_s15 + $0x70] sm:$0xff]  ;;  %v309_v40 = vld [vmem:[%s2406_s15 + $0xe8] sm:$0xff]  ;;  %v295_v41 = vld [vmem:[%s2406_s15 + $0x78] sm:$0xff]  ;;  %2119 = vmatpush3.bf16.msra.mxu0 %v2116_v49 }
  0x22   : > { %1943 = vmatmul.mubr.msk.f32.gmra.mrb[4].mxu0 %vm323_vm0, %v285_v21  ;;  %v310_v42 = vld [vmem:[%s2406_s15 + $0xf0] sm:$0xff]  ;;  %v311_v43 = vld [vmem:[%s2406_s15 + $0xf8] sm:$0xff]  ;;  %s2293_s15 = smov [#allocation2]  }
  0x23   : > { %1945 = vmatprep.mubr.msk.f32.mxu0 %vm323_vm0, %v286_v23  ;;  %1967 = vmatmul.mubr.msk.f32.gmra.mrb[4].mxu1 %vm323_vm0, %v301_v24  ;;  %s2233_s16 = sshll.u32 %s2293_s15, 4  ;;  %s2234_s16 = int_to_ptr.vmem [resolvable:$false] %s2233_s16 }
  0x24   : > { %1969 = vmatprep.mubr.msk.f32.mxu1 %vm323_vm0, %v302_v26  ;;  %s2235_s17 = scalar_lea.vmem %s2234_s16, 8192  ;;  %p2236_p0 = scmp.lt.s32.totalorder %s2849_s29, %s2234_s16 }
  0x25   : > { %p2237_p1 = scmp.lt.s32.totalorder %s2235_s17, %s2229_s14 }
  0x26   : > { %1946 = vmatmul.mubr.msk.f32.gmra.mrb[6].mxu0 %vm323_vm0, %v287_v25 }
  0x27   : > { %1948 = vmatprep.mubr.msk.f32.mxu0 %vm323_vm0, %v288_v27  ;;  %1970 = vmatmul.mubr.msk.f32.gmra.mrb[6].mxu1 %vm323_vm0, %v303_v28  ;;  %p2238_p2 = por %p2237_p1, %p2236_p0 }
  0x28   : > { %1972 = vmatprep.mubr.msk.f32.mxu1 %vm323_vm0, %v304_v30 }
  0x29   : > { %p2239_p3 = pnand %p2238_p2, %p2232_p13 }
  0x2a   : > { %1949 = vmatmul.mubr.msk.f32.gmra.mrb[8].mxu0 %vm323_vm0, %v289_v29 }
  0x2b   : > { %1951 = vmatprep.mubr.msk.f32.mxu0 %vm323_vm0, %v290_v31  ;;  %1973 = vmatmul.mubr.msk.f32.gmra.mrb[8].mxu1 %vm323_vm0, %v305_v32 }
  0x2c   : > { %1975 = vmatprep.mubr.msk.f32.mxu1 %vm323_vm0, %v306_v34 }
  0x2e   : > { %1952 = vmatmul.mubr.msk.f32.gmra.mrb[10].mxu0 %vm323_vm0, %v291_v33 }
  0x2f   : > { %1954 = vmatprep.mubr.msk.f32.mxu0 %vm323_vm0, %v292_v35  ;;  %1976 = vmatmul.mubr.msk.f32.gmra.mrb[10].mxu1 %vm323_vm0, %v307_v36 }
  0x30   : > { %1978 = vmatprep.mubr.msk.f32.mxu1 %vm323_vm0, %v308_v38 }
  0x32   : > { %1955 = vmatmul.mubr.msk.f32.gmra.mrb[12].mxu0 %vm323_vm0, %v293_v37 }
  0x33   : > { %1957 = vmatprep.mubr.msk.f32.mxu0 %vm323_vm0, %v294_v39  ;;  %1979 = vmatmul.mubr.msk.f32.gmra.mrb[12].mxu1 %vm323_vm0, %v309_v40 }
  0x34   : > { %1981 = vmatprep.mubr.msk.f32.mxu1 %vm323_vm0, %v310_v42 }
  0x36   : > { %1958 = vmatmul.mubr.msk.f32.gmra.mrb[14].mxu0 %vm323_vm0, %v295_v41 }
  0x37   : > { %1982 = vmatmul.mubr.msk.f32.gmra.mrb[14].mxu1 %vm323_vm0, %v311_v43 }
  0xed   : > { %v1938_v51 = vpop.f32.mrb[0].mxu0 }
  0xee   : > { %v492_v52 = vadd.f32 %v1938_v51, %v2493_v50  ;;  %v486_v53 = vpop.f32.mrb[1].mxu0  ;;  %v2497_v55 = vpop.f32.mrb[0].mxu1 }
  0xef   : > { %v487_v54 = vadd.f32 %v2493_v50, %v486_v53  ;;  %v566_v58 = vpop.f32.mrb[1].mxu1 }
  0xf0   : > { %v646_v59 = vmax.f32 %v492_v52, 0.0  ;;  %v567_v42 = vadd.f32 %v2493_v50, %v566_v58 }
  0xf1   : > { %v645_v56 = vmax.f32 %v487_v54, 0.0  ;;  %v1941_v57 = vpop.f32.mrb[2].mxu0 }
  0xf2   : > { %v502_v60 = vadd.f32 %v1941_v57, %v2493_v50  ;;  %v496_v61 = vpop.f32.mrb[3].mxu0  ;;  %v2503_v63 = vpop.f32.mrb[2].mxu1  ;;  %v661_v51 = vmax.f32 %v567_v42, 0.0 }
  0xf3   : > { %v497_v62 = vadd.f32 %v2493_v50, %v496_v61  ;;  %1992 = vmatprep.mubr.msk.f32.mxu1 %vm323_vm0, %v645_v56  ;;  %v576_v2 = vpop.f32.mrb[3].mxu1  ;;  %v572_v56 = vadd.f32 %v2497_v55, %v2493_v50 }
  0xf4   : > { %1993 = vmatmul.mubr.msk.f32.vlgmr.msra.gmra.mrb[16].mxu1 %vm323_vm0, %v646_v59  ;;  %v648_v3 = vmax.f32 %v502_v60, 0.0  ;;  %v577_v52 = vadd.f32 %v2493_v50, %v576_v2  ;;  %v582_v60 = vadd.f32 %v2503_v63, %v2493_v50 }
  0xf5   : > { %v647_v0 = vmax.f32 %v497_v62, 0.0  ;;  %v1944_v1 = vpop.f32.mrb[4].mxu0  ;;  %v662_v59 = vmax.f32 %v572_v56, 0.0 }
  0xf6   : > { %v512_v4 = vadd.f32 %v1944_v1, %v2493_v50  ;;  %v506_v5 = vpop.f32.mrb[5].mxu0  ;;  %v2509_v7 = vpop.f32.mrb[4].mxu1  ;;  %v663_v57 = vmax.f32 %v577_v52, 0.0  ;;  %v664_v62 = vmax.f32 %v582_v60, 0.0 }
  0xf7   : > { %v507_v6 = vadd.f32 %v2493_v50, %v506_v5  ;;  %1995 = vmatprep.mubr.msk.f32.mxu1 %vm323_vm0, %v647_v0  ;;  %v586_v10 = vpop.f32.mrb[5].mxu1  ;;  %v592_v0 = vadd.f32 %v2509_v7, %v2493_v50 }
  0xf8   : > { %1996 = vmatmul.mubr.msk.f32.gmra.mrb[18].mxu1 %vm323_vm0, %v648_v3  ;;  %v650_v11 = vmax.f32 %v512_v4, 0.0  ;;  %v587_v58 = vadd.f32 %v2493_v50, %v586_v10 }
  0xf9   : > { %v649_v8 = vmax.f32 %v507_v6, 0.0  ;;  %v1947_v9 = vpop.f32.mrb[6].mxu0  ;;  %v666_v3 = vmax.f32 %v592_v0, 0.0 }
  0xfa   : > { %v522_v12 = vadd.f32 %v1947_v9, %v2493_v50  ;;  %v516_v13 = vpop.f32.mrb[7].mxu0  ;;  %v2515_v15 = vpop.f32.mrb[6].mxu1  ;;  %v665_v61 = vmax.f32 %v587_v58, 0.0 }
  0xfb   : > { %v517_v14 = vadd.f32 %v2493_v50, %v516_v13  ;;  %1998 = vmatprep.mubr.msk.f32.mxu1 %vm323_vm0, %v649_v8  ;;  %v596_v18 = vpop.f32.mrb[7].mxu1  ;;  %v602_v63 = vadd.f32 %v2515_v15, %v2493_v50 }
  0xfc   : > { %1999 = vmatmul.mubr.msk.f32.gmra.mrb[20].mxu1 %vm323_vm0, %v650_v11  ;;  %v652_v19 = vmax.f32 %v522_v12, 0.0  ;;  %v597_v55 = vadd.f32 %v2493_v50, %v596_v18 }
  0xfd   : > { %v651_v16 = vmax.f32 %v517_v14, 0.0  ;;  %v1950_v17 = vpop.f32.mrb[8].mxu0  ;;  %v668_v6 = vmax.f32 %v602_v63, 0.0 }
  0xfe   : > { %v532_v20 = vadd.f32 %v1950_v17, %v2493_v50  ;;  %v526_v21 = vpop.f32.mrb[9].mxu0  ;;  %v1974_v23 = vpop.f32.mrb[8].mxu1  ;;  %v667_v1 = vmax.f32 %v597_v55, 0.0 }
  0xff   : > { %v527_v22 = vadd.f32 %v2493_v50, %v526_v21  ;;  %2001 = vmatprep.mubr.msk.f32.mxu1 %vm323_vm0, %v651_v16  ;;  %v606_v26 = vpop.f32.mrb[9].mxu1  ;;  %v612_v7 = vadd.f32 %v1974_v23, %v2493_v50 }
 0x100   : > { %2002 = vmatmul.mubr.msk.f32.gmra.mrb[22].mxu1 %vm323_vm0, %v652_v19  ;;  %v654_v27 = vmax.f32 %v532_v20, 0.0  ;;  %v607_v2 = vadd.f32 %v2493_v50, %v606_v26  ;;  %v2574_v20 = vld [vmem:[%s2901_s4] ss:$0 sm:$0xff] }
 0x101   : > { %v653_v24 = vmax.f32 %v527_v22, 0.0  ;;  %v1953_v25 = vpop.f32.mrb[10].mxu0  ;;  %v670_v10 = vmax.f32 %v612_v7, 0.0 }
 0x102   : > { %v542_v28 = vadd.f32 %v1953_v25, %v2493_v50  ;;  %v536_v29 = vpop.f32.mrb[11].mxu0  ;;  %v1977_v31 = vpop.f32.mrb[10].mxu1  ;;  %v669_v4 = vmax.f32 %v607_v2, 0.0 }
 0x103   : > { %v537_v30 = vadd.f32 %v2493_v50, %v536_v29  ;;  %2004 = vmatprep.mubr.msk.f32.mxu1 %vm323_vm0, %v653_v24  ;;  %v616_v34 = vpop.f32.mrb[11].mxu1  ;;  %v622_v11 = vadd.f32 %v1977_v31, %v2493_v50 }
 0x104   : > { %2005 = vmatmul.mubr.msk.f32.gmra.mrb[24].mxu1 %vm323_vm0, %v654_v27  ;;  %v656_v35 = vmax.f32 %v542_v28, 0.0  ;;  %v617_v5 = vadd.f32 %v2493_v50, %v616_v34 }
 0x105   : > { %v655_v32 = vmax.f32 %v537_v30, 0.0  ;;  %v1956_v33 = vpop.f32.mrb[12].mxu0  ;;  %v672_v14 = vmax.f32 %v622_v11, 0.0 }
 0x106   : > { %v552_v36 = vadd.f32 %v1956_v33, %v2493_v50  ;;  %v546_v37 = vpop.f32.mrb[13].mxu0  ;;  %v1980_v39 = vpop.f32.mrb[12].mxu1  ;;  %v671_v8 = vmax.f32 %v617_v5, 0.0 }
 0x107   : > { %v547_v38 = vadd.f32 %v2493_v50, %v546_v37  ;;  %2007 = vmatprep.mubr.msk.f32.mxu1 %vm323_vm0, %v655_v32  ;;  %v626_v43 = vpop.f32.mrb[13].mxu1  ;;  %v632_v15 = vadd.f32 %v1980_v39, %v2493_v50 }
 0x108   : > { %2008 = vmatmul.mubr.msk.f32.gmra.mrb[26].mxu1 %vm323_vm0, %v656_v35  ;;  %v658_v44 = vmax.f32 %v552_v36, 0.0  ;;  %v627_v9 = vadd.f32 %v2493_v50, %v626_v43 }
 0x109   : > { %v657_v40 = vmax.f32 %v547_v38, 0.0  ;;  %v1959_v41 = vpop.f32.mrb[14].mxu0  ;;  %v674_v17 = vmax.f32 %v632_v15, 0.0 }
 0x10a   : > { %v562_v45 = vadd.f32 %v1959_v41, %v2493_v50  ;;  %v556_v46 = vpop.f32.mrb[15].mxu0  ;;  %v1983_v48 = vpop.f32.mrb[14].mxu1  ;;  %v673_v12 = vmax.f32 %v627_v9, 0.0 }
 0x10b   : > { %v557_v47 = vadd.f32 %v2493_v50, %v556_v46  ;;  %2010 = vmatprep.mubr.msk.f32.mxu1 %vm323_vm0, %v657_v40  ;;  %v636_v53 = vpop.f32.mrb[15].mxu1  ;;  %v642_v18 = vadd.f32 %v1983_v48, %v2493_v50 }
 0x10c   : > { %2011 = vmatmul.mubr.msk.f32.gmra.mrb[28].mxu1 %vm323_vm0, %v658_v44  ;;  %v660_v54 = vmax.f32 %v562_v45, 0.0  ;;  %v637_v13 = vadd.f32 %v2493_v50, %v636_v53 }
 0x10d   : > { %v659_v49 = vmax.f32 %v557_v47, 0.0  ;;  %v676_v19 = vmax.f32 %v642_v18, 0.0 }
 0x10e   : > { %v675_v16 = vmax.f32 %v637_v13, 0.0 }
 0x10f   : > { %2013 = vmatprep.mubr.msk.f32.mxu1 %vm323_vm0, %v659_v49 }
 0x110   : > { %2014 = vmatmul.mubr.msk.f32.gmra.mrb[30].mxu1 %vm323_vm0, %v660_v54 }
 0x111   : > { %2016 = vmatprep.mubr.msk.f32.mxu1 %vm323_vm0, %v661_v51 }
 0x114   : > { %2017 = vmatmul.mubr.msk.f32.gmra.mrb[32].mxu1 %vm323_vm0, %v662_v59 }
 0x115   : > { %2019 = vmatprep.mubr.msk.f32.mxu1 %vm323_vm0, %v663_v57 }
 0x118   : > { %2020 = vmatmul.mubr.msk.f32.gmra.mrb[34].mxu1 %vm323_vm0, %v664_v62 }
 0x119   : > { %2022 = vmatprep.mubr.msk.f32.mxu1 %vm323_vm0, %v665_v61 }
 0x11c   : > { %2023 = vmatmul.mubr.msk.f32.gmra.mrb[36].mxu1 %vm323_vm0, %v666_v3 }
 0x11d   : > { %2025 = vmatprep.mubr.msk.f32.mxu1 %vm323_vm0, %v667_v1 }
 0x120   : > { %2026 = vmatmul.mubr.msk.f32.gmra.mrb[38].mxu1 %vm323_vm0, %v668_v6 }
 0x121   : > { %2028 = vmatprep.mubr.msk.f32.mxu1 %vm323_vm0, %v669_v4 }
 0x124   : > { %2029 = vmatmul.mubr.msk.f32.gmra.mrb[40].mxu1 %vm323_vm0, %v670_v10 }
 0x125   : > { %2031 = vmatprep.mubr.msk.f32.mxu1 %vm323_vm0, %v671_v8 }
 0x128   : > { %2032 = vmatmul.mubr.msk.f32.gmra.mrb[42].mxu1 %vm323_vm0, %v672_v14 }
 0x129   : > { %2034 = vmatprep.mubr.msk.f32.mxu1 %vm323_vm0, %v673_v12 }
 0x12c   : > { %2035 = vmatmul.mubr.msk.f32.gmra.mrb[44].mxu1 %vm323_vm0, %v674_v17 }
 0x12d   : > { %2037 = vmatprep.mubr.msk.f32.mxu1 %vm323_vm0, %v675_v16 }
 0x130   : > { %2038 = vmatmul.mubr.msk.f32.gmra.mrb[46].mxu1 %vm323_vm0, %v676_v19 }
 0x1c7   : > { %v1994_v21 = vpop.f32.mrb[16].mxu1 }
 0x1c8   : > { %v856_v22 = vadd.f32 %v1994_v21, %v2574_v20  ;;  %v850_v23 = vpop.f32.mrb[17].mxu1 }
 0x1c9   : > { %v851_v24 = vadd.f32 %v2574_v20, %v850_v23 }
 0x1ca   : > { %v1010_v26 = vmax.f32 %v856_v22, 0.0 }
 0x1cb   : > { %v1009_v25 = vmax.f32 %v851_v24, 0.0  ;;  %v1997_v50 = vpop.f32.mrb[18].mxu1 }
 0x1cc   : > { %v866_v27 = vadd.f32 %v1997_v50, %v2574_v20  ;;  %v860_v28 = vpop.f32.mrb[19].mxu1 }
 0x1cd   : > { %v861_v29 = vadd.f32 %v2574_v20, %v860_v28  ;;  %2048 = vmatprep.mubr.msk.f32.mxu0 %vm323_vm0, %v1009_v25 }
 0x1ce   : > { %2049 = vmatmul.mubr.msk.f32.vlgmr.msra.gmra.mrb[16].mxu0 %vm323_vm0, %v1010_v26  ;;  %v1012_v32 = vmax.f32 %v866_v27, 0.0 }
 0x1cf   : > { %v1011_v30 = vmax.f32 %v861_v29, 0.0  ;;  %v2000_v31 = vpop.f32.mrb[20].mxu1 }
 0x1d0   : > { %v876_v33 = vadd.f32 %v2000_v31, %v2574_v20  ;;  %v870_v34 = vpop.f32.mrb[21].mxu1 }
 0x1d1   : > { %v871_v35 = vadd.f32 %v2574_v20, %v870_v34  ;;  %2051 = vmatprep.mubr.msk.f32.mxu0 %vm323_vm0, %v1011_v30 }
 0x1d2   : > { %2052 = vmatmul.mubr.msk.f32.gmra.mrb[18].mxu0 %vm323_vm0, %v1012_v32  ;;  %v1014_v38 = vmax.f32 %v876_v33, 0.0 }
 0x1d3   : > { %v1013_v36 = vmax.f32 %v871_v35, 0.0  ;;  %v2003_v37 = vpop.f32.mrb[22].mxu1 }
 0x1d4   : > { %v886_v39 = vadd.f32 %v2003_v37, %v2574_v20  ;;  %v880_v40 = vpop.f32.mrb[23].mxu1 }
 0x1d5   : > { %v881_v41 = vadd.f32 %v2574_v20, %v880_v40  ;;  %2054 = vmatprep.mubr.msk.f32.mxu0 %vm323_vm0, %v1013_v36 }
 0x1d6   : > { %2055 = vmatmul.mubr.msk.f32.gmra.mrb[20].mxu0 %vm323_vm0, %v1014_v38  ;;  %v1016_v44 = vmax.f32 %v886_v39, 0.0 }
 0x1d7   : > { %v1015_v42 = vmax.f32 %v881_v41, 0.0  ;;  %v2006_v43 = vpop.f32.mrb[24].mxu1 }
 0x1d8   : > { %v896_v45 = vadd.f32 %v2006_v43, %v2574_v20  ;;  %v890_v46 = vpop.f32.mrb[25].mxu1 }
 0x1d9   : > { %v891_v47 = vadd.f32 %v2574_v20, %v890_v46  ;;  %2057 = vmatprep.mubr.msk.f32.mxu0 %vm323_vm0, %v1015_v42 }
 0x1da   : > { %2058 = vmatmul.mubr.msk.f32.gmra.mrb[22].mxu0 %vm323_vm0, %v1016_v44  ;;  %v1018_v51 = vmax.f32 %v896_v45, 0.0 }
 0x1db   : > { %v1017_v48 = vmax.f32 %v891_v47, 0.0  ;;  %v2009_v49 = vpop.f32.mrb[26].mxu1 }
 0x1dc   : > { %v906_v52 = vadd.f32 %v2009_v49, %v2574_v20  ;;  %v900_v53 = vpop.f32.mrb[27].mxu1 }
 0x1dd   : > { %v901_v54 = vadd.f32 %v2574_v20, %v900_v53  ;;  %2060 = vmatprep.mubr.msk.f32.mxu0 %vm323_vm0, %v1017_v48 }
 0x1de   : > { %2061 = vmatmul.mubr.msk.f32.gmra.mrb[24].mxu0 %vm323_vm0, %v1018_v51  ;;  %v1020_v58 = vmax.f32 %v906_v52, 0.0 }
 0x1df   : > { %v1019_v56 = vmax.f32 %v901_v54, 0.0  ;;  %v2012_v57 = vpop.f32.mrb[28].mxu1  ;;  %v1373_v54 = vlaneseq }
 0x1e0   : > { %v916_v59 = vadd.f32 %v2012_v57, %v2574_v20  ;;  %v910_v60 = vpop.f32.mrb[29].mxu1 }
 0x1e1   : > { %v911_v61 = vadd.f32 %v2574_v20, %v910_v60  ;;  %2063 = vmatprep.mubr.msk.f32.mxu0 %vm323_vm0, %v1019_v56  ;;  %v2643_v56 = vld [vmem:[%s2903_s6] ss:$0 sm:$0xff]  ;;  %v2645_v57 = vand.u32 127, %v1373_v54 }
 0x1e2   : > { %2064 = vmatmul.mubr.msk.f32.gmra.mrb[26].mxu0 %vm323_vm0, %v1020_v58  ;;  %v1022_v0 = vmax.f32 %v916_v59, 0.0 }
 0x1e3   : > { %v1021_v55 = vmax.f32 %v911_v61, 0.0  ;;  %v2015_v62 = vpop.f32.mrb[30].mxu1  ;;  %vm1375_vm1 = vcmp.eq.s32.totalorder %v2645_v57, 0 }
 0x1e4   : > { %v926_v1 = vadd.f32 %v2015_v62, %v2574_v20  ;;  %v920_v2 = vpop.f32.mrb[31].mxu1 }
 0x1e5   : > { %v921_v3 = vadd.f32 %v2574_v20, %v920_v2  ;;  %2066 = vmatprep.mubr.msk.f32.mxu0 %vm323_vm0, %v1021_v55 }
 0x1e6   : > { %2067 = vmatmul.mubr.msk.f32.gmra.mrb[28].mxu0 %vm323_vm0, %v1022_v0  ;;  %v1024_v5 = vmax.f32 %v926_v1, 0.0 }
 0x1e7   : > { %v1023_v63 = vmax.f32 %v921_v3, 0.0  ;;  %v2018_v4 = vpop.f32.mrb[32].mxu1 }
 0x1e8   : > { %v936_v6 = vadd.f32 %v2018_v4, %v2574_v20  ;;  %v930_v7 = vpop.f32.mrb[33].mxu1 }
 0x1e9   : > { %v931_v8 = vadd.f32 %v2574_v20, %v930_v7  ;;  %2069 = vmatprep.mubr.msk.f32.mxu0 %vm323_vm0, %v1023_v63 }
 0x1ea   : > { %2070 = vmatmul.mubr.msk.f32.gmra.mrb[30].mxu0 %vm323_vm0, %v1024_v5  ;;  %v1026_v11 = vmax.f32 %v936_v6, 0.0 }
 0x1eb   : > { %v1025_v9 = vmax.f32 %v931_v8, 0.0  ;;  %v2021_v10 = vpop.f32.mrb[34].mxu1 }
 0x1ec   : > { %v946_v12 = vadd.f32 %v2021_v10, %v2574_v20  ;;  %v940_v13 = vpop.f32.mrb[35].mxu1 }
 0x1ed   : > { %v941_v14 = vadd.f32 %v2574_v20, %v940_v13  ;;  %2072 = vmatprep.mubr.msk.f32.mxu0 %vm323_vm0, %v1025_v9 }
 0x1ee   : > { %2073 = vmatmul.mubr.msk.f32.gmra.mrb[32].mxu0 %vm323_vm0, %v1026_v11  ;;  %v1028_v17 = vmax.f32 %v946_v12, 0.0 }
 0x1ef   : > { %v1027_v15 = vmax.f32 %v941_v14, 0.0  ;;  %v2024_v16 = vpop.f32.mrb[36].mxu1 }
 0x1f0   : > { %v956_v18 = vadd.f32 %v2024_v16, %v2574_v20  ;;  %v950_v19 = vpop.f32.mrb[37].mxu1 }
 0x1f1   : > { %v951_v21 = vadd.f32 %v2574_v20, %v950_v19  ;;  %2075 = vmatprep.mubr.msk.f32.mxu0 %vm323_vm0, %v1027_v15 }
 0x1f2   : > { %2076 = vmatmul.mubr.msk.f32.gmra.mrb[34].mxu0 %vm323_vm0, %v1028_v17  ;;  %v1030_v24 = vmax.f32 %v956_v18, 0.0 }
 0x1f3   : > { %v1029_v22 = vmax.f32 %v951_v21, 0.0  ;;  %v2027_v23 = vpop.f32.mrb[38].mxu1 }
 0x1f4   : > { %v966_v25 = vadd.f32 %v2027_v23, %v2574_v20  ;;  %v960_v50 = vpop.f32.mrb[39].mxu1 }
 0x1f5   : > { %v961_v26 = vadd.f32 %v2574_v20, %v960_v50  ;;  %2078 = vmatprep.mubr.msk.f32.mxu0 %vm323_vm0, %v1029_v22 }
 0x1f6   : > { %2079 = vmatmul.mubr.msk.f32.gmra.mrb[36].mxu0 %vm323_vm0, %v1030_v24  ;;  %v1032_v29 = vmax.f32 %v966_v25, 0.0 }
 0x1f7   : > { %v1031_v27 = vmax.f32 %v961_v26, 0.0  ;;  %v2030_v28 = vpop.f32.mrb[40].mxu1 }
 0x1f8   : > { %v976_v30 = vadd.f32 %v2030_v28, %v2574_v20  ;;  %v970_v31 = vpop.f32.mrb[41].mxu1 }
 0x1f9   : > { %v971_v32 = vadd.f32 %v2574_v20, %v970_v31  ;;  %2081 = vmatprep.mubr.msk.f32.mxu0 %vm323_vm0, %v1031_v27 }
 0x1fa   : > { %2082 = vmatmul.mubr.msk.f32.gmra.mrb[38].mxu0 %vm323_vm0, %v1032_v29  ;;  %v1034_v35 = vmax.f32 %v976_v30, 0.0 }
 0x1fb   : > { %v1033_v33 = vmax.f32 %v971_v32, 0.0  ;;  %v2033_v34 = vpop.f32.mrb[42].mxu1 }
 0x1fc   : > { %v986_v36 = vadd.f32 %v2033_v34, %v2574_v20  ;;  %v980_v37 = vpop.f32.mrb[43].mxu1 }
 0x1fd   : > { %v981_v38 = vadd.f32 %v2574_v20, %v980_v37  ;;  %2084 = vmatprep.mubr.msk.f32.mxu0 %vm323_vm0, %v1033_v33 }
 0x1fe   : > { %2085 = vmatmul.mubr.msk.f32.gmra.mrb[40].mxu0 %vm323_vm0, %v1034_v35  ;;  %v1036_v41 = vmax.f32 %v986_v36, 0.0 }
 0x1ff   : > { %v1035_v39 = vmax.f32 %v981_v38, 0.0  ;;  %v2036_v40 = vpop.f32.mrb[44].mxu1 }
 0x200   : > { %v996_v42 = vadd.f32 %v2036_v40, %v2574_v20  ;;  %v990_v43 = vpop.f32.mrb[45].mxu1 }
 0x201   : > { %v991_v44 = vadd.f32 %v2574_v20, %v990_v43  ;;  %2087 = vmatprep.mubr.msk.f32.mxu0 %vm323_vm0, %v1035_v39 }
 0x202   : > { %2088 = vmatmul.mubr.msk.f32.gmra.mrb[42].mxu0 %vm323_vm0, %v1036_v41  ;;  %v1038_v47 = vmax.f32 %v996_v42, 0.0 }
 0x203   : > { %v1037_v45 = vmax.f32 %v991_v44, 0.0  ;;  %v2039_v46 = vpop.f32.mrb[46].mxu1 }
 0x204   : > { %v1006_v48 = vadd.f32 %v2039_v46, %v2574_v20  ;;  %v1000_v49 = vpop.f32.mrb[47].mxu1 }
 0x205   : > { %v1001_v51 = vadd.f32 %v2574_v20, %v1000_v49  ;;  %2090 = vmatprep.mubr.msk.f32.mxu0 %vm323_vm0, %v1037_v45 }
 0x206   : > { %2091 = vmatmul.mubr.msk.f32.gmra.mrb[44].mxu0 %vm323_vm0, %v1038_v47  ;;  %v1040_v53 = vmax.f32 %v1006_v48, 0.0 }
 0x207   : > { %v1039_v52 = vmax.f32 %v1001_v51, 0.0 }
 0x209   : > { %2093 = vmatprep.mubr.msk.f32.mxu0 %vm323_vm0, %v1039_v52 }
 0x20a   : > { %2094 = vmatmul.mubr.msk.f32.gmra.mrb[46].mxu0 %vm323_vm0, %v1040_v53 }
 0x2a1   : > { %v2050_v58 = vpop.f32.mrb[16].mxu0 }
 0x2a2   : > { %v1220_v20 = vadd.f32 %v2050_v58, %v2643_v56  ;;  %v1214_v59 = vpop.f32.mrb[17].mxu0 }
 0x2a3   : > { %v1215_v60 = vadd.f32 %v2643_v56, %v1214_v59 }
 0x2a4   : > { %v1377_v61 = vmul.f32 0.5, %v1220_v20 }
 0x2a5   : > { %v1376_v55 = vmul.f32 0.5, %v1215_v60  ;;  %v2053_v62 = vpop.f32.mrb[18].mxu0 }
 0x2a6   : > { %v1409_v0 = vsel %vm1375_vm1, %v1377_v61, %v1220_v20  ;;  %v1230_v1 = vadd.f32 %v2053_v62, %v2643_v56  ;;  %v1224_v2 = vpop.f32.mrb[19].mxu0 }
 0x2a7   : > { %2165 = vtanh.f32 %v1409_v0  ;;  %v1408_v3 = vsel %vm1375_vm1, %v1376_v55, %v1215_v60  ;;  %v1225_v63 = vadd.f32 %v2643_v56, %v1224_v2 }
 0x2a8   : > { %2167 = vtanh.f32 %v1408_v3  ;;  %v1379_v4 = vmul.f32 0.5, %v1230_v1 }
 0x2a9   : > { %v1378_v5 = vmul.f32 0.5, %v1225_v63  ;;  %v2056_v6 = vpop.f32.mrb[20].mxu0 }
 0x2aa   : > { %v1411_v7 = vsel %vm1375_vm1, %v1379_v4, %v1230_v1  ;;  %v1240_v8 = vadd.f32 %v2056_v6, %v2643_v56  ;;  %v1234_v9 = vpop.f32.mrb[21].mxu0 }
 0x2ab   : > { %2169 = vtanh.f32 %v1411_v7  ;;  %v1410_v10 = vsel %vm1375_vm1, %v1378_v5, %v1225_v63  ;;  %v1235_v11 = vadd.f32 %v2643_v56, %v1234_v9 }
 0x2ac   : > { %2171 = vtanh.f32 %v1410_v10  ;;  %v1381_v12 = vmul.f32 0.5, %v1240_v8 }
 0x2ad   : > { %v1380_v13 = vmul.f32 0.5, %v1235_v11  ;;  %v2059_v14 = vpop.f32.mrb[22].mxu0 }
 0x2ae   : > { %v1413_v15 = vsel %vm1375_vm1, %v1381_v12, %v1240_v8  ;;  %v1250_v16 = vadd.f32 %v2059_v14, %v2643_v56  ;;  %v1244_v17 = vpop.f32.mrb[23].mxu0 }
 0x2af   : > { %2173 = vtanh.f32 %v1413_v15  ;;  %v1412_v18 = vsel %vm1375_vm1, %v1380_v13, %v1235_v11  ;;  %v1245_v19 = vadd.f32 %v2643_v56, %v1244_v17 }
 0x2b0   : > { %2175 = vtanh.f32 %v1412_v18  ;;  %v1383_v21 = vmul.f32 0.5, %v1250_v16 }
 0x2b1   : > { %v2166_v22 = vpop.eup %2165  ;;  %v1382_v23 = vmul.f32 0.5, %v1245_v19  ;;  %v2062_v24 = vpop.f32.mrb[24].mxu0 }
 0x2b2   : > { %v2168_v25 = vpop.eup %2167  ;;  %v1473_v50 = vmul.f32 0.5, %v2166_v22  ;;  %v1415_v26 = vsel %vm1375_vm1, %v1383_v21, %v1250_v16  ;;  %v1260_v27 = vadd.f32 %v2062_v24, %v2643_v56  ;;  %v1254_v28 = vpop.f32.mrb[25].mxu0  ;;  %v1537_v29 = vmul.f32 3.0, %v2166_v22 }
 0x2b3   : > { %v1472_v30 = vmul.f32 0.5, %v2168_v25  ;;  %2177 = vtanh.f32 %v1415_v26  ;;  %v1414_v31 = vsel %vm1375_vm1, %v1382_v23, %v1245_v19  ;;  %v1255_v34 = vadd.f32 %v2643_v56, %v1254_v28 }
 0x2b4   : > { %v1505_v32 = vadd.f32 0.5, %v1473_v50  ;;  %2179 = vtanh.f32 %v1414_v31  ;;  %v1385_v33 = vmul.f32 0.5, %v1260_v27  ;;  %v1536_v37 = vmul.f32 3.0, %v2168_v25 }
 0x2b5   : > { %v2170_v35 = vpop.eup %2169  ;;  %v1504_v36 = vadd.f32 0.5, %v1472_v30  ;;  %v2065_v38 = vpop.f32.mrb[26].mxu0  ;;  %v1384_v48 = vmul.f32 0.5, %v1255_v34 }
 0x2b6   : > { %v2172_v39 = vpop.eup %2171  ;;  %v1569_v40 = vsel %vm1375_vm1, %v1505_v32, %v1537_v29  ;;  %v1475_v41 = vmul.f32 0.5, %v2170_v35  ;;  %v1417_v42 = vsel %vm1375_vm1, %v1385_v33, %v1260_v27  ;;  %v1264_v43 = vpop.f32.mrb[27].mxu0  ;;  %v1539_v45 = vmul.f32 3.0, %v2170_v35 }
 0x2b7   : > { %1601 = vst [vmem:[%s2681_s22 + $0x8] sm:$0xff] %v1569_v40  ;;  %v1568_v44 = vsel %vm1375_vm1, %v1504_v36, %v1536_v37  ;;  %v1474_v46 = vmul.f32 0.5, %v2172_v39  ;;  %2181 = vtanh.f32 %v1417_v42  ;;  %v1270_v49 = vadd.f32 %v2065_v38, %v2643_v56 }
 0x2b8   : > { %1600 = vst [vmem:[%s2681_s22] sm:$0xff] %v1568_v44  ;;  %v1507_v47 = vadd.f32 0.5, %v1475_v41  ;;  %v1265_v51 = vadd.f32 %v2643_v56, %v1264_v43  ;;  %v1538_v54 = vmul.f32 3.0, %v2172_v39  ;;  %v1416_v61 = vsel %vm1375_vm1, %v1384_v48, %v1255_v34 }
 0x2b9   : > { %v2174_v52 = vpop.eup %2173  ;;  %v1506_v53 = vadd.f32 0.5, %v1474_v46  ;;  %v2068_v58 = vpop.f32.mrb[28].mxu0  ;;  %2183 = vtanh.f32 %v1416_v61  ;;  %v1387_v3 = vmul.f32 0.5, %v1270_v49 }
 0x2ba   : > { %v2176_v20 = vpop.eup %2175  ;;  %v1571_v59 = vsel %vm1375_vm1, %v1507_v47, %v1539_v45  ;;  %v1477_v60 = vmul.f32 0.5, %v2174_v52  ;;  %v1274_v55 = vpop.f32.mrb[29].mxu0  ;;  %v1541_v0 = vmul.f32 3.0, %v2174_v52  ;;  %v1386_v63 = vmul.f32 0.5, %v1265_v51 }
 0x2bb   : > { %1603 = vst [vmem:[%s2681_s22 + $0x18] sm:$0xff] %v1571_v59  ;;  %v1570_v62 = vsel %vm1375_vm1, %v1506_v53, %v1538_v54  ;;  %v1476_v1 = vmul.f32 0.5, %v2176_v20  ;;  %v1280_v4 = vadd.f32 %v2068_v58, %v2643_v56  ;;  %v1540_v7 = vmul.f32 3.0, %v2176_v20 }
 0x2bc   : > { %1602 = vst [vmem:[%s2681_s22 + $0x10] sm:$0xff] %v1570_v62  ;;  %v1509_v2 = vadd.f32 0.5, %v1477_v60  ;;  %v1275_v8 = vadd.f32 %v2643_v56, %v1274_v55  ;;  %v1419_v14 = vsel %vm1375_vm1, %v1387_v3, %v1270_v49  ;;  %v1418_v21 = vsel %vm1375_vm1, %v1386_v63, %v1265_v51 }
 0x2bd   : > { %v2178_v5 = vpop.eup %2177  ;;  %v1508_v6 = vadd.f32 0.5, %v1476_v1  ;;  %v2071_v9 = vpop.f32.mrb[30].mxu0  ;;  %2185 = vtanh.f32 %v1419_v14  ;;  %v1389_v22 = vmul.f32 0.5, %v1280_v4 }
 0x2be   : > { %v2180_v10 = vpop.eup %2179  ;;  %v1573_v11 = vsel %vm1375_vm1, %v1509_v2, %v1541_v0  ;;  %v1479_v12 = vmul.f32 0.5, %v2178_v5  ;;  %v1543_v13 = vmul.f32 3.0, %v2178_v5  ;;  %v1284_v15 = vpop.f32.mrb[31].mxu0  ;;  %v1388_v23 = vmul.f32 0.5, %v1275_v8 }
 0x2bf   : > { %1605 = vst [vmem:[%s2681_s22 + $0x28] sm:$0xff] %v1573_v11  ;;  %v1572_v16 = vsel %vm1375_vm1, %v1508_v6, %v1540_v7  ;;  %v1478_v17 = vmul.f32 0.5, %v2180_v10  ;;  %v1542_v18 = vmul.f32 3.0, %v2180_v10  ;;  %2187 = vtanh.f32 %v1418_v21 }
 0x2c0   : > { %1604 = vst [vmem:[%s2681_s22 + $0x20] sm:$0xff] %v1572_v16  ;;  %v1511_v19 = vadd.f32 0.5, %v1479_v12  ;;  %v1290_v50 = vadd.f32 %v2071_v9, %v2643_v56  ;;  %v1285_v26 = vadd.f32 %v2643_v56, %v1284_v15  ;;  %v1421_v31 = vsel %vm1375_vm1, %v1389_v22, %v1280_v4 }
 0x2c1   : > { %v2182_v24 = vpop.eup %2181  ;;  %v1510_v25 = vadd.f32 0.5, %v1478_v17  ;;  %v2074_v27 = vpop.f32.mrb[32].mxu0  ;;  %2189 = vtanh.f32 %v1421_v31  ;;  %v1420_v34 = vsel %vm1375_vm1, %v1388_v23, %v1275_v8 }
 0x2c2   : > { %v1575_v28 = vsel %vm1375_vm1, %v1511_v19, %v1543_v13  ;;  %v1481_v29 = vmul.f32 0.5, %v2182_v24  ;;  %v1545_v30 = vmul.f32 3.0, %v2182_v24  ;;  %v1294_v32 = vpop.f32.mrb[33].mxu0  ;;  %v1391_v35 = vmul.f32 0.5, %v1290_v50 }
 0x2c3   : > { %1607 = vst [vmem:[%s2681_s22 + $0x38] sm:$0xff] %v1575_v28  ;;  %v1574_v33 = vsel %vm1375_vm1, %v1510_v25, %v1542_v18  ;;  %2191 = vtanh.f32 %v1420_v34  ;;  %v1390_v37 = vmul.f32 0.5, %v1285_v26  ;;  %v1300_v38 = vadd.f32 %v2074_v27, %v2643_v56  ;;  %v2184_v39 = vpop.eup %2183 }
 0x2c4   : > { %1606 = vst [vmem:[%s2681_s22 + $0x30] sm:$0xff] %v1574_v33  ;;  %v1513_v36 = vadd.f32 0.5, %v1481_v29  ;;  %v1423_v40 = vsel %vm1375_vm1, %v1391_v35, %v1290_v50  ;;  %v1295_v41 = vadd.f32 %v2643_v56, %v1294_v32  ;;  %v1480_v44 = vmul.f32 0.5, %v2184_v39 }
 0x2c5   : > { %v2077_v42 = vpop.f32.mrb[34].mxu0  ;;  %2193 = vtanh.f32 %v1423_v40  ;;  %v1422_v46 = vsel %vm1375_vm1, %v1390_v37, %v1285_v26  ;;  %v1393_v47 = vmul.f32 0.5, %v1300_v38  ;;  %v1544_v52 = vmul.f32 3.0, %v2184_v39 }
 0x2c6   : > { %v1577_v43 = vsel %vm1375_vm1, %v1513_v36, %v1545_v30  ;;  %v1304_v45 = vpop.f32.mrb[35].mxu0  ;;  %v1392_v48 = vmul.f32 0.5, %v1295_v41  ;;  %v1310_v49 = vadd.f32 %v2077_v42, %v2643_v56  ;;  %v1512_v51 = vadd.f32 0.5, %v1480_v44 }
 0x2c7   : > { %1609 = vst [vmem:[%s2681_s22 + $0x48] sm:$0xff] %v1577_v43  ;;  %2195 = vtanh.f32 %v1422_v46  ;;  %v1305_v53 = vadd.f32 %v2643_v56, %v1304_v45  ;;  %v2186_v54 = vpop.eup %2185  ;;  %v1425_v58 = vsel %vm1375_vm1, %v1393_v47, %v1300_v38 }
 0x2c8   : > { %v1424_v20 = vsel %vm1375_vm1, %v1392_v48, %v1295_v41  ;;  %v1395_v59 = vmul.f32 0.5, %v1310_v49  ;;  %v1576_v61 = vsel %vm1375_vm1, %v1512_v51, %v1544_v52  ;;  %v1483_v55 = vmul.f32 0.5, %v2186_v54 }
 0x2c9   : > { %v2080_v60 = vpop.f32.mrb[36].mxu0  ;;  %2197 = vtanh.f32 %v1425_v58  ;;  %v2188_v0 = vpop.eup %2187  ;;  %1608 = vst [vmem:[%s2681_s22 + $0x40] sm:$0xff] %v1576_v61  ;;  %v1394_v2 = vmul.f32 0.5, %v1305_v53  ;;  %v1547_v4 = vmul.f32 3.0, %v2186_v54 }
 0x2ca   : > { %v1314_v62 = vpop.f32.mrb[37].mxu0  ;;  %2199 = vtanh.f32 %v1424_v20  ;;  %v1427_v1 = vsel %vm1375_vm1, %v1395_v59, %v1310_v49  ;;  %v1320_v3 = vadd.f32 %v2080_v60, %v2643_v56  ;;  %v1515_v63 = vadd.f32 0.5, %v1483_v55 }
 0x2cb   : > { %v1482_v5 = vmul.f32 0.5, %v2188_v0  ;;  %2201 = vtanh.f32 %v1427_v1  ;;  %v2190_v6 = vpop.eup %2189  ;;  %v1546_v7 = vmul.f32 3.0, %v2188_v0  ;;  %v1426_v8 = vsel %vm1375_vm1, %v1394_v2, %v1305_v53 }
 0x2cc   : > { %v1397_v9 = vmul.f32 0.5, %v1320_v3  ;;  %v1315_v10 = vadd.f32 %v2643_v56, %v1314_v62  ;;  %v1579_v13 = vsel %vm1375_vm1, %v1515_v63, %v1547_v4  ;;  %v1485_v15 = vmul.f32 0.5, %v2190_v6 }
 0x2cd   : > { %v2083_v11 = vpop.f32.mrb[38].mxu0  ;;  %v2192_v12 = vpop.eup %2191  ;;  %v1514_v14 = vadd.f32 0.5, %v1482_v5  ;;  %v1549_v16 = vmul.f32 3.0, %v2190_v6  ;;  %1611 = vst [vmem:[%s2681_s22 + $0x58] sm:$0xff] %v1579_v13  ;;  %2203 = vtanh.f32 %v1426_v8 }
 0x2ce   : > { %v1324_v17 = vpop.f32.mrb[39].mxu0  ;;  %v1484_v18 = vmul.f32 0.5, %v2192_v12  ;;  %v1548_v19 = vmul.f32 3.0, %v2192_v12  ;;  %v1429_v21 = vsel %vm1375_vm1, %v1397_v9, %v1320_v3  ;;  %v1517_v24 = vadd.f32 0.5, %v1485_v15 }
 0x2cf   : > { %v2194_v22 = vpop.eup %2193  ;;  %v1578_v23 = vsel %vm1375_vm1, %v1514_v14, %v1546_v7  ;;  %2205 = vtanh.f32 %v1429_v21  ;;  %v1396_v25 = vmul.f32 0.5, %v1315_v10  ;;  %v1330_v28 = vadd.f32 %v2083_v11, %v2643_v56 }
 0x2d0   : > { %1610 = vst [vmem:[%s2681_s22 + $0x50] sm:$0xff] %v1578_v23  ;;  %v1516_v50 = vadd.f32 0.5, %v1484_v18  ;;  %v1487_v26 = vmul.f32 0.5, %v2194_v22  ;;  %v1551_v27 = vmul.f32 3.0, %v2194_v22  ;;  %v1581_v31 = vsel %vm1375_vm1, %v1517_v24, %v1549_v16 }
 0x2d1   : > { %v2086_v29 = vpop.f32.mrb[40].mxu0  ;;  %v2196_v30 = vpop.eup %2195  ;;  %v1428_v32 = vsel %vm1375_vm1, %v1396_v25, %v1315_v10  ;;  %v1325_v33 = vadd.f32 %v2643_v56, %v1324_v17  ;;  %1613 = vst [vmem:[%s2681_s22 + $0x68] sm:$0xff] %v1581_v31  ;;  %v1399_v41 = vmul.f32 0.5, %v1330_v28 }
 0x2d2   : > { %v1340_v34 = vadd.f32 %v2086_v29, %v2643_v56  ;;  %v1334_v35 = vpop.f32.mrb[41].mxu0  ;;  %v1580_v36 = vsel %vm1375_vm1, %v1516_v50, %v1548_v19  ;;  %v1519_v37 = vadd.f32 0.5, %v1487_v26  ;;  %v1486_v38 = vmul.f32 0.5, %v2196_v30 }
 0x2d3   : > { %v1550_v39 = vmul.f32 3.0, %v2196_v30  ;;  %v2198_v40 = vpop.eup %2197  ;;  %1612 = vst [vmem:[%s2681_s22 + $0x60] sm:$0xff] %v1580_v36  ;;  %2207 = vtanh.f32 %v1428_v32  ;;  %v1398_v42 = vmul.f32 0.5, %v1325_v33  ;;  %v1431_v54 = vsel %vm1375_vm1, %v1399_v41, %v1330_v28 }
 0x2d4   : > { %v1401_v43 = vmul.f32 0.5, %v1340_v34  ;;  %v2200_v44 = vpop.eup %2199  ;;  %v1583_v45 = vsel %vm1375_vm1, %v1519_v37, %v1551_v27  ;;  %v1518_v46 = vadd.f32 0.5, %v1486_v38  ;;  %v1489_v47 = vmul.f32 0.5, %v2198_v40 }
 0x2d5   : > { %v1553_v48 = vmul.f32 3.0, %v2198_v40  ;;  %v2089_v49 = vpop.f32.mrb[42].mxu0  ;;  %v2202_v51 = vpop.eup %2201  ;;  %1615 = vst [vmem:[%s2681_s22 + $0x78] sm:$0xff] %v1583_v45  ;;  %v1488_v52 = vmul.f32 0.5, %v2200_v44  ;;  %v1552_v53 = vmul.f32 3.0, %v2200_v44  ;;  %v1430_v58 = vsel %vm1375_vm1, %v1398_v42, %v1325_v33 }
 0x2d6   : > { %v1344_v20 = vpop.f32.mrb[43].mxu0  ;;  %v1582_v59 = vsel %vm1375_vm1, %v1518_v46, %v1550_v39  ;;  %v1521_v60 = vadd.f32 0.5, %v1489_v47  ;;  %v1491_v61 = vmul.f32 0.5, %v2202_v51  ;;  %v1555_v55 = vmul.f32 3.0, %v2202_v51 }
 0x2d7   : > { %1614 = vst [vmem:[%s2681_s22 + $0x70] sm:$0xff] %v1582_v59  ;;  %v1520_v62 = vadd.f32 0.5, %v1488_v52  ;;  %2209 = vtanh.f32 %v1431_v54  ;;  %v1433_v0 = vsel %vm1375_vm1, %v1401_v43, %v1340_v34  ;;  %v1335_v1 = vadd.f32 %v2643_v56, %v1334_v35  ;;  %v2204_v2 = vpop.eup %2203 }
 0x2d8   : > { %v1585_v3 = vsel %vm1375_vm1, %v1521_v60, %v1553_v48  ;;  %v1523_v63 = vadd.f32 0.5, %v1491_v61  ;;  %2211 = vtanh.f32 %v1430_v58  ;;  %v1350_v4 = vadd.f32 %v2089_v49, %v2643_v56 }
 0x2d9   : > { %v2092_v5 = vpop.f32.mrb[44].mxu0  ;;  %v2206_v6 = vpop.eup %2205  ;;  %1617 = vst [vmem:[%s2681_s22 + $0x88] sm:$0xff] %v1585_v3  ;;  %v1584_v7 = vsel %vm1375_vm1, %v1520_v62, %v1552_v53  ;;  %v1490_v8 = vmul.f32 0.5, %v2204_v2  ;;  %2213 = vtanh.f32 %v1433_v0  ;;  %v1554_v11 = vmul.f32 3.0, %v2204_v2 }
 0x2da   : > { %v1354_v9 = vpop.f32.mrb[45].mxu0  ;;  %1616 = vst [vmem:[%s2681_s22 + $0x80] sm:$0xff] %v1584_v7  ;;  %v1587_v10 = vsel %vm1375_vm1, %v1523_v63, %v1555_v55  ;;  %v1493_v12 = vmul.f32 0.5, %v2206_v6  ;;  %v1400_v13 = vmul.f32 0.5, %v1335_v1  ;;  %v1403_v15 = vmul.f32 0.5, %v1350_v4 }
 0x2db   : > { %1619 = vst [vmem:[%s2681_s22 + $0x98] sm:$0xff] %v1587_v10  ;;  %v1522_v14 = vadd.f32 0.5, %v1490_v8  ;;  %v1345_v16 = vadd.f32 %v2643_v56, %v1344_v20  ;;  %v1360_v17 = vadd.f32 %v2092_v5, %v2643_v56  ;;  %v1557_v19 = vmul.f32 3.0, %v2206_v6 }
 0x2dc   : > { %v1525_v18 = vadd.f32 0.5, %v1493_v12  ;;  %v1432_v21 = vsel %vm1375_vm1, %v1400_v13, %v1335_v1  ;;  %v1355_v22 = vadd.f32 %v2643_v56, %v1354_v9  ;;  %v1435_v50 = vsel %vm1375_vm1, %v1403_v15, %v1350_v4 }
 0x2dd   : > { %v2095_v23 = vpop.f32.mrb[46].mxu0  ;;  %v2208_v24 = vpop.eup %2207  ;;  %v1586_v25 = vsel %vm1375_vm1, %v1522_v14, %v1554_v11  ;;  %2215 = vtanh.f32 %v1432_v21  ;;  %v1402_v26 = vmul.f32 0.5, %v1345_v16  ;;  %v1405_v31 = vmul.f32 0.5, %v1360_v17 }
 0x2de   : > { %v1364_v27 = vpop.f32.mrb[47].mxu0  ;;  %1618 = vst [vmem:[%s2681_s22 + $0x90] sm:$0xff] %v1586_v25  ;;  %v1589_v28 = vsel %vm1375_vm1, %v1525_v18, %v1557_v19  ;;  %v1492_v29 = vmul.f32 0.5, %v2208_v24  ;;  %2217 = vtanh.f32 %v1435_v50  ;;  %v1404_v32 = vmul.f32 0.5, %v1355_v22 }
 0x2df   : > { %1621 = vst [vmem:[%s2681_s22 + $0xa8] sm:$0xff] %v1589_v28  ;;  %v1434_v30 = vsel %vm1375_vm1, %v1402_v26, %v1345_v16  ;;  %v1370_v33 = vadd.f32 %v2095_v23, %v2643_v56  ;;  %v1556_v35 = vmul.f32 3.0, %v2208_v24  ;;  %v1365_v36 = vadd.f32 %v2643_v56, %v1364_v27 }
 0x2e0   : > { %v1524_v34 = vadd.f32 0.5, %v1492_v29  ;;  %2219 = vtanh.f32 %v1434_v30  ;;  %v1437_v38 = vsel %vm1375_vm1, %v1405_v31, %v1360_v17  ;;  %v1436_v39 = vsel %vm1375_vm1, %v1404_v32, %v1355_v22 }
 0x2e1   : > { %v2210_v37 = vpop.eup %2209  ;;  %v1407_v40 = vmul.f32 0.5, %v1370_v33  ;;  %2221 = vtanh.f32 %v1437_v38  ;;  %v1406_v52 = vmul.f32 0.5, %v1365_v36 }
 0x2e2   : > { %v2212_v41 = vpop.eup %2211  ;;  %v1588_v42 = vsel %vm1375_vm1, %v1524_v34, %v1556_v35  ;;  %v1495_v43 = vmul.f32 0.5, %v2210_v37  ;;  %2223 = vtanh.f32 %v1436_v39  ;;  %v1559_v47 = vmul.f32 3.0, %v2210_v37 }
 0x2e3   : > { %v2214_v44 = vpop.eup %2213  ;;  %1620 = vst [vmem:[%s2681_s22 + $0xa0] sm:$0xff] %v1588_v42  ;;  %v1494_v45 = vmul.f32 0.5, %v2212_v41  ;;  %v1439_v56 = vsel %vm1375_vm1, %v1407_v40, %v1370_v33  ;;  %v1558_v51 = vmul.f32 3.0, %v2212_v41  ;;  %v1438_v60 = vsel %vm1375_vm1, %v1406_v52, %v1365_v36 }
 0x2e4   : > { %v1527_v46 = vadd.f32 0.5, %v1495_v43  ;;  %v1497_v48 = vmul.f32 0.5, %v2214_v44  ;;  %2225 = vtanh.f32 %v1439_v56  ;;  %v1561_v58 = vmul.f32 3.0, %v2214_v44 }
 0x2e5   : > { %v1526_v49 = vadd.f32 0.5, %v1494_v45  ;;  %2227 = vtanh.f32 %v1438_v60 }
 0x2e6   : > { %v1591_v53 = vsel %vm1375_vm1, %v1527_v46, %v1559_v47  ;;  %v1529_v54 = vadd.f32 0.5, %v1497_v48 }
 0x2e7   : > { %v2216_v20 = vpop.eup %2215  ;;  %1623 = vst [vmem:[%s2681_s22 + $0xb8] sm:$0xff] %v1591_v53  ;;  %v1590_v59 = vsel %vm1375_vm1, %v1526_v49, %v1558_v51 }
 0x2e8   : > { %v2218_v61 = vpop.eup %2217  ;;  %1622 = vst [vmem:[%s2681_s22 + $0xb0] sm:$0xff] %v1590_v59  ;;  %v1593_v55 = vsel %vm1375_vm1, %v1529_v54, %v1561_v58  ;;  %v1496_v62 = vmul.f32 0.5, %v2216_v20  ;;  %v1560_v3 = vmul.f32 3.0, %v2216_v20 }
 0x2e9   : > { %1625 = vst [vmem:[%s2681_s22 + $0xc8] sm:$0xff] %v1593_v55  ;;  %v1499_v0 = vmul.f32 0.5, %v2218_v61  ;;  %v1563_v4 = vmul.f32 3.0, %v2218_v61 }
 0x2ea   : > { %v2220_v1 = vpop.eup %2219  ;;  %v1528_v2 = vadd.f32 0.5, %v1496_v62 }
 0x2eb   : > { %v1531_v63 = vadd.f32 0.5, %v1499_v0  ;;  %v1498_v5 = vmul.f32 0.5, %v2220_v1  ;;  %v2222_v6 = vpop.eup %2221  ;;  %v1562_v11 = vmul.f32 3.0, %v2220_v1 }
 0x2ec   : > { %v1592_v7 = vsel %vm1375_vm1, %v1528_v2, %v1560_v3  ;;  %v2224_v8 = vpop.eup %2223  ;;  %v1501_v12 = vmul.f32 0.5, %v2222_v6  ;;  %v1565_v17 = vmul.f32 3.0, %v2222_v6 }
 0x2ed   : > { %1624 = vst [vmem:[%s2681_s22 + $0xc0] sm:$0xff] %v1592_v7  ;;  %v1595_v9 = vsel %vm1375_vm1, %v1531_v63, %v1563_v4  ;;  %v1530_v10 = vadd.f32 0.5, %v1498_v5  ;;  %v1500_v14 = vmul.f32 0.5, %v2224_v8  ;;  %v1564_v21 = vmul.f32 3.0, %v2224_v8 }
 0x2ee   : > { %v2226_v13 = vpop.eup %2225  ;;  %1627 = vst [vmem:[%s2681_s22 + $0xd8] sm:$0xff] %v1595_v9  ;;  %v1533_v16 = vadd.f32 0.5, %v1501_v12 }
 0x2ef   : > { %v1594_v15 = vsel %vm1375_vm1, %v1530_v10, %v1562_v11  ;;  %v1503_v18 = vmul.f32 0.5, %v2226_v13  ;;  %v1532_v19 = vadd.f32 0.5, %v1500_v14  ;;  %v1567_v24 = vmul.f32 3.0, %v2226_v13  ;;  %v2228_v25 = vpop.eup %2227 }
 0x2f0   : > { %1626 = vst [vmem:[%s2681_s22 + $0xd0] sm:$0xff] %v1594_v15  ;;  %v1597_v22 = vsel %vm1375_vm1, %v1533_v16, %v1565_v17  ;;  %v1502_v27 = vmul.f32 0.5, %v2228_v25  ;;  %v1566_v29 = vmul.f32 3.0, %v2228_v25 }
 0x2f1   : > { %v1535_v23 = vadd.f32 0.5, %v1503_v18  ;;  %1629 = vst [vmem:[%s2681_s22 + $0xe8] sm:$0xff] %v1597_v22  ;;  %v1596_v50 = vsel %vm1375_vm1, %v1532_v19, %v1564_v21 }
 0x2f2   : > { %1628 = vst [vmem:[%s2681_s22 + $0xe0] sm:$0xff] %v1596_v50  ;;  %v1534_v28 = vadd.f32 0.5, %v1502_v27 }
 0x2f3   : > { %v1599_v26 = vsel %vm1375_vm1, %v1535_v23, %v1567_v24 }
 0x2f4   : > { %1631 = vst [vmem:[%s2681_s22 + $0xf8] sm:$0xff] %v1599_v26  ;;  %v1598_v30 = vsel %vm1375_vm1, %v1534_v28, %v1566_v29 }
 0x2f5   : > { %1630 = vst [vmem:[%s2681_s22 + $0xf0] sm:$0xff] %v1598_v30 }
 0x2f6   : > { %2242 = shalt.err (!%p2239_p3)
}
 0x2f7   : > { %s2243_s18 = scalar_lea.hbm %s2847_s13, 4096  ;;  %s2247_s21 = scalar_lea.hbm %s2904_s7, 8192 }
 0x2f8   : > { %p2244_p4 = scmp.ne.s32.totalorder %s2847_s13, %s2243_s18  ;;  %p2248_p9 = scmp.lt.u32.totalorder %s2847_s13, %s2904_s7 }
 0x2f9   : > { %p2249_p10 = scmp.lt.u32.totalorder %s2247_s21, %s2243_s18  ;;  %p2251_p12 = scmp.lt.u32.totalorder %s2243_s18, %s2847_s13 }
 0x2fa   : > { %p2245_p7 = pnand %p2244_p4, %p2374_p5 }
 0x2fb   : > { %p2250_p11 = por %p2249_p10, %p2248_p9 }
 0x2fc   : > { %p2246_p8 = pneg %p2245_p7 }
 0x2fd   : > { %p2252_p13 = por %p2251_p12, %p2250_p11 }
 0x2ff   : > { %p2253_p0 = pnand %p2252_p13, %p2246_p8 }
 0x301   : > { %2256 = shalt.err (!%p2253_p0)
}
 0x302   : > { %s2294_s8 = smov 128   ;;  %s2295_s9 = smov 8  }
 0x303   : > { %2124 = dma.vmem_to_hbm [thread:$0]  (%p2374_p5), %s2849_s29, 4096, %s2847_s13, %s2856_s28, %s2294_s8, %s2294_s8, %s2295_s9  }
 0x304 PF: > { %p2130_p1 = scmp.ge.s32.totalorder %s2291_s27, 2  ;;  %s1661_s14 = sand.u32 1, %s2279_s24  }
 0x305   : > { %s1662_s15 = scalar_lea.sflag [#allocation3], %s1661_s14 }
 0x306   : > { %p2127_p2 = pnand %p2130_p1, %p2378_p6 }
 0x308   : > { %2274 = dma.done.wait (!%p2127_p2), %s1662_s15, 4096  }
 0x309   : > { %2276 = vsyncadd (!%p2127_p2), %s1662_s15, 4294963200  ;;  %p17_p3 = scmp.ge.s32.totalorder %s2361_s30, 4   ;;  %s2907_s24 = smov %s2283_s25 }
 0x30a   : > { %s2908_s25 = smov %s2287_s26  ;;  %s2909_s26 = smov %s2372_s10 }
 0x30b   : > { %s2910_s27 = smov %s2361_s30  ;;  %19 = sbr.rel (!%p17_p3) target bundleno = 3 (0x3), region = 83 }
 0x312   :  { %1667 = vsyncpa [#allocation3], 1 }
 0x313   :  { %1669 = vsyncpa [#allocation3 + $0x1], 1 }

</bundles_post_ra>
